<compile_context>
chip_gen: v7x
topology: tpu7x:2x2x1
jax: 0.10.0
libtpu: 0.0.40
codegen_flags: <defaults>
</compile_context>

<pallas_src>
import math

import jax
import jax.numpy as jnp
from jax.experimental import pallas as pl
from jax.experimental.pallas import tpu as pltpu


# -----------------------------------------------------------------------------
# Pallas kernel: one sequence tile of x plus the matching PE tile.
# -----------------------------------------------------------------------------
def _pe_add_kernel(x_ref, pe_ref, o_ref):
    # x: (tm, N, E), pe: (tm, 1, E).  Broadcast over the batch (sublane) axis is
    # in-register VPU work; add in f32 regardless of storage dtype.
    x = x_ref[...].astype(jnp.float32)
    pe = pe_ref[...].astype(jnp.float32)
    o_ref[...] = (x + pe).astype(o_ref.dtype)


def make_positional_encoding(max_seq_len, dim_embedding):
    """Same buffer PyTorch registers: (max_seq_len, 1, dim_embedding), f32."""
    assert dim_embedding % 2 == 0, "dim_embedding must be even (matches PyTorch module)"
    position = jnp.arange(max_seq_len, dtype=jnp.float32)[:, None]
    denom = jnp.exp(
        jnp.arange(0, dim_embedding, 2, dtype=jnp.float32)
        * (-math.log(10000.0) / dim_embedding)
    )
    pe = jnp.zeros((max_seq_len, dim_embedding), jnp.float32)
    pe = pe.at[:, 0::2].set(jnp.sin(position * denom))
    pe = pe.at[:, 1::2].set(jnp.cos(position * denom))
    return pe[:, None, :]  # (max_seq_len, 1, dim_embedding)


def _choose_seq_tile(T, N, E, x_itemsize, target_block_bytes=2 << 20):
    """Byte-budgeted sequence tile: ~target_block_bytes of x per block."""
    row_bytes = max(N * E * x_itemsize, 1)
    tm = max(8, target_block_bytes // row_bytes)
    # Keep >= 2 grid steps when T allows, so v7x's two TensorCores both run.
    if T >= 16:
        tm = min(tm, pl.cdiv(T, 2))
    tm = min(tm, T)
    if tm >= 8:
        tm -= tm % 8          # sublane-friendly; not required (last two dims are full)
    return max(int(tm), 1)


def positional_encoding_forward(x, pe_buffer):
    """x: (T, N, E) seq-first (nn.Transformer default), f32 or bf16.
    pe_buffer: (max_seq_len, 1, E) f32.  Returns x + pe[:T] (dropout = identity).

    Note: x is donated to the output via input_output_aliases."""
    T, N, E = x.shape
    assert pe_buffer.shape[0] >= T and pe_buffer.shape[2] == E

    itemsize = jnp.dtype(x.dtype).itemsize
    tm = _choose_seq_tile(T, N, E, itemsize)
    grid = (pl.cdiv(T, tm),)

    # Live VMEM: double-buffered x in, double-buffered out, double-buffered pe.
    block_x_bytes = tm * N * E * itemsize
    pe_block_bytes = tm * E * jnp.dtype(pe_buffer.dtype).itemsize
    needed = 4 * block_x_bytes + 2 * pe_block_bytes
    vmem_limit = int(min(max(2 * needed, 4 << 20), 32 << 20))

    out = pl.pallas_call(
        _pe_add_kernel,
        out_shape=jax.ShapeDtypeStruct((T, N, E), x.dtype),
        grid=grid,
        in_specs=[
            pl.BlockSpec((tm, N, E), lambda i: (i, 0, 0)),
            # Full (max_seq_len, 1, E) buffer; only blocks 0..cdiv(T,tm)-1 are DMA'd.
            pl.BlockSpec((tm, 1, E), lambda i: (i, 0, 0)),
        ],
        out_specs=pl.BlockSpec((tm, N, E), lambda i: (i, 0, 0)),
        input_output_aliases={0: 0},  # donate x -> out (same shape & dtype)
        compiler_params=pltpu.CompilerParams(
            dimension_semantics=("parallel",),
            vmem_limit_bytes=vmem_limit,
        ),
    )(x, pe_buffer)
    return out


# -----------------------------------------------------------------------------
if __name__ == "__main__":
    # Small shapes consistent with the module: seq=8, batch=2, hidden=32.
    T, N, E = 8, 2, 32
    max_seq_len = 5000

    key = jax.random.PRNGKey(0)
    x = jax.random.normal(key, (T, N, E), dtype=jnp.float32)
    pe_buffer = make_positional_encoding(max_seq_len, E)

    # Pure-JAX reference (eval-mode dropout == identity).  Computed BEFORE the
    # kernel call because x is donated to the kernel output.
    ref = x + pe_buffer[:T]
    ref = jax.block_until_ready(ref)

    out = positional_encoding_forward(x, pe_buffer)
    out = jax.block_until_ready(out)

    assert out.shape == (T, N, E) and out.dtype == jnp.float32
    assert bool(jnp.all(jnp.isfinite(out)))
    assert bool(jnp.allclose(out, ref, atol=1e-6, rtol=1e-6))
    print("KERNEL_OK")
</pallas_src>

<mosaic_0001>
module attributes {stable_mosaic.version = 11 : i64} {
  func.func @_pe_add_kernel(%arg0: i32, %arg1: memref<8x2x32xf32, #tpu.memory_space<vmem>>, %arg2: memref<8x1x32xf32, #tpu.memory_space<vmem>>, %arg3: memref<8x2x32xf32, #tpu.memory_space<vmem>>) attributes {dimension_semantics = [#tpu.dimension_semantics<parallel>], iteration_bounds = array<i64: 1>, scalar_prefetch = 0 : i64, scratch_operands = 0 : i64, tpu.core_type = #tpu.core_type<tc>, window_params = [{transform_indices = @transform_0, window_bounds = array<i64: 8, 2, 32>}, {transform_indices = @transform_1, window_bounds = array<i64: 8, 1, 32>}, {transform_indices = @transform_2, window_bounds = array<i64: 8, 2, 32>}]} {
    %c0 = arith.constant 0 : index
    %c0_0 = arith.constant 0 : index
    %c0_1 = arith.constant 0 : index
    %0 = vector.load %arg1[%c0, %c0_0, %c0_1] : memref<8x2x32xf32, #tpu.memory_space<vmem>>, vector<8x2x32xf32>
    %c0_2 = arith.constant 0 : index
    %c0_3 = arith.constant 0 : index
    %c0_4 = arith.constant 0 : index
    %1 = vector.load %arg2[%c0_2, %c0_3, %c0_4] : memref<8x1x32xf32, #tpu.memory_space<vmem>>, vector<8x1x32xf32>
    %2 = vector.broadcast %1 : vector<8x1x32xf32> to vector<8x2x32xf32>
    %3 = arith.addf %0, %2 : vector<8x2x32xf32>
    %c0_5 = arith.constant 0 : index
    %c0_6 = arith.constant 0 : index
    %c0_7 = arith.constant 0 : index
    %4 = vector.load %arg3[%c0_5, %c0_6, %c0_7] : memref<8x2x32xf32, #tpu.memory_space<vmem>>, vector<8x2x32xf32>
    tpu.vector_store %arg3[%c0_5, %c0_6, %c0_7], %3 {strides = array<i32>} : memref<8x2x32xf32, #tpu.memory_space<vmem>>, vector<8x2x32xf32>,
    return
  }
  func.func @transform_0(%arg0: i32) -> (i32, i32, i32) {
    %c0_i32 = arith.constant 0 : i32
    %c0_i32_0 = arith.constant 0 : i32
    %c0_i32_1 = arith.constant 0 : i32
    return %arg0, %c0_i32, %c0_i32_0 : i32, i32, i32
  }
  func.func @transform_1(%arg0: i32) -> (i32, i32, i32) {
    %c0_i32 = arith.constant 0 : i32
    %c0_i32_0 = arith.constant 0 : i32
    %c0_i32_1 = arith.constant 0 : i32
    return %arg0, %c0_i32, %c0_i32_0 : i32, i32, i32
  }
  func.func @transform_2(%arg0: i32) -> (i32, i32, i32) {
    %c0_i32 = arith.constant 0 : i32
    %c0_i32_0 = arith.constant 0 : i32
    %c0_i32_1 = arith.constant 0 : i32
    return %arg0, %c0_i32, %c0_i32_0 : i32, i32, i32
  }
}

</mosaic_0001>

<bundles_post_ra>
// kernel: tpu_custom_call.1
= control target key start
LH: loop header
LB: loop body
LE: loop exit
PB: predicated region body
PF: predicated region fallthrough
CT: control target
= control target key end

     0   :  { %7 = vsyncpa [#allocation3], 0  ;;  %s268_s0 = inlined_call_operand.hbm [shape: f32[8,2,32], index: 0, kind: input, shape index: {}, may-alias: {0,2}]   ;;  %s269_s1 = inlined_call_operand.vmem [shape: f32[5000,1,32], index: 1, kind: input, shape index: {}]   ;;  %s270_s2 = inlined_call_operand.hbm [shape: f32[8,2,32], index: 2, kind: output, shape index: {}, may-alias: {0,2}]  }
   0x1   :  { %8 = vsyncpa [#allocation4], 0  ;;  %s184_s9 = smov [#allocation2]   ;;  %s136_s13 = scalar_lea.hbm %s268_s0, 256 }
   0x2   :  { %s14_s10 = sshll.u32 %s184_s9, 4  ;;  %p137_p0 = scmp.ne.s32.totalorder %s268_s0, %s136_s13  ;;  %s15_s10 = int_to_ptr.vmem [resolvable:$true] %s14_s10 }
   0x3   :  { %p140_p1 = scmp.lt.u32.totalorder %s136_s13, %s268_s0 }
   0x5   :  { %p142_p2 = pnand %p140_p1, %p137_p0 }
   0x7   :  { %145 = shalt.err (!%p142_p2)
}
   0x8   :  { %s146_s18 = scalar_lea.vmem %s15_s10, 256  ;;  %p151_p4 = scmp.lt.s32.totalorder %s15_s10, %s15_s10 }
   0x9   :  { %p147_p3 = scmp.ne.s32.totalorder %s15_s10, %s146_s18  ;;  %p152_p5 = scmp.lt.s32.totalorder %s146_s18, %s146_s18 }
   0xb   :  { %p153_p6 = por %p152_p5, %p151_p4 }
   0xd   :  { %p154_p7 = pnand %p153_p6, %p147_p3 }
   0xf   :  { %157 = shalt.err (!%p154_p7)
}
  0x10   :  { %s185_s19 = smov 32   ;;  %s186_s20 = smov 2  }
  0x11   :  { %20 = dma.hbm_to_vmem [thread:$0]  %s268_s0, 256, %s15_s10, [#allocation3], %s185_s19, %s185_s19, %s186_s20  }
  0x12   :  { %180 = dma.done.wait [#allocation3], 256  }
  0x13   :  { %181 = vsyncadd [#allocation3], 4294967040  ;;  %vm98_vm0 = vcmask 254976   ;;  %s187_s23 = smov [#allocation5]   ;;  %v26_v0 = vld [vmem:[#allocation2] sm:$0x3] }
  0x14   :  { %s218_s24 = sshll.u32 %s187_s23, 4  ;;  %v124_v1 = vld [vmem:[%s269_s1] ss:$0 sm:$0xff]  ;;  %v27_v2 = vld [vmem:[#allocation2 + $0x2] sm:$0x3]  ;;  %s113_s24 = int_to_ptr.vmem [resolvable:$true] %s218_s24 }
  0x15   :  { %v90_v3 = vadd.f32 %v124_v1, %v26_v0  ;;  %v125_v4 = vld [vmem:[%s269_s1 + $0x1] ss:$0 sm:$0xff]  ;;  %v28_v5 = vld [vmem:[#allocation2 + $0x4] sm:$0x3]  ;;  %v126_v6 = vld [vmem:[%s269_s1 + $0x2] ss:$0 sm:$0xff]  ;;  %p163_p9 = scmp.lt.s32.totalorder %s113_s24, %s113_s24 }
  0x16   :  { %v91_v7 = vadd.f32 %v125_v4, %v27_v2  ;;  %v92_v8 = vadd.f32 %v126_v6, %v28_v5  ;;  %v29_v9 = vld [vmem:[#allocation2 + $0x6] sm:$0x3]  ;;  %v127_v10 = vld [vmem:[%s269_s1 + $0x3] ss:$0 sm:$0xff]  ;;  %v30_v11 = vld [vmem:[#allocation2 + $0x8] sm:$0x3] }
  0x17   :  { %99 = vst.msk [vmem:[#allocation5] sm:$0x3] %vm98_vm0, %v90_v3  ;;  %v93_v12 = vadd.f32 %v127_v10, %v29_v9  ;;  %v128_v13 = vld [vmem:[%s269_s1 + $0x4] ss:$0 sm:$0xff]  ;;  %v31_v14 = vld [vmem:[#allocation2 + $0xa] sm:$0x3] }
  0x18   :  { %v129_v15 = vld [vmem:[%s269_s1 + $0x5] ss:$0 sm:$0xff]  ;;  %100 = vst.msk [vmem:[#allocation5 + $0x2] sm:$0x3] %vm98_vm0, %v91_v7  ;;  %101 = vst.msk [vmem:[#allocation5 + $0x4] sm:$0x3] %vm98_vm0, %v92_v8  ;;  %v94_v16 = vadd.f32 %v128_v13, %v30_v11 }
  0x19   :  { %v95_v17 = vadd.f32 %v129_v15, %v31_v14  ;;  %v32_v18 = vld [vmem:[#allocation2 + $0xc] sm:$0x3]  ;;  %v130_v19 = vld [vmem:[%s269_s1 + $0x6] ss:$0 sm:$0xff]  ;;  %v33_v20 = vld [vmem:[#allocation2 + $0xe] sm:$0x3] }
  0x1a   :  { %102 = vst.msk [vmem:[#allocation5 + $0x6] sm:$0x3] %vm98_vm0, %v93_v12  ;;  %v96_v21 = vadd.f32 %v130_v19, %v32_v18  ;;  %v131_v22 = vld [vmem:[%s269_s1 + $0x7] ss:$0 sm:$0xff]  ;;  %103 = vst.msk [vmem:[#allocation5 + $0x8] sm:$0x3] %vm98_vm0, %v94_v16 }
  0x1b   :  { %104 = vst.msk [vmem:[#allocation5 + $0xa] sm:$0x3] %vm98_vm0, %v95_v17  ;;  %v97_v23 = vadd.f32 %v131_v22, %v33_v20  ;;  %s158_s12 = scalar_lea.vmem %s113_s24, 256 }
  0x1c   :  { %105 = vst.msk [vmem:[#allocation5 + $0xc] sm:$0x3] %vm98_vm0, %v96_v21  ;;  %p159_p8 = scmp.ne.s32.totalorder %s113_s24, %s158_s12  ;;  %p164_p10 = scmp.lt.s32.totalorder %s158_s12, %s158_s12 }
  0x1d   :  { %106 = vst.msk [vmem:[#allocation5 + $0xe] sm:$0x3] %vm98_vm0, %v97_v23 }
  0x1e   :  { %p165_p11 = por %p164_p10, %p163_p9 }
  0x20   :  { %p166_p12 = pnand %p165_p11, %p159_p8 }
  0x22   :  { %169 = shalt.err (!%p166_p12)
}
  0x23   :  { %s170_s1 = scalar_lea.hbm %s270_s2, 256 }
  0x24   :  { %p171_p13 = scmp.ne.s32.totalorder %s270_s2, %s170_s1  ;;  %p174_p0 = scmp.lt.u32.totalorder %s170_s1, %s270_s2 }
  0x26   :  { %p176_p1 = pnand %p174_p0, %p171_p13 }
  0x28   :  { %179 = shalt.err (!%p176_p1)
}
  0x29   :  { %118 = dma.vmem_to_hbm [thread:$0]  %s113_s24, 256, %s270_s2, [#allocation4], %s185_s19, %s185_s19, %s186_s20  }
  0x2a   :  { %182 = dma.done.wait [#allocation4], 256  }
  0x2b   :  { %183 = vsyncadd [#allocation4], 4294967040 }
  0x2c   :  { %122 = vsyncpa [#allocation3], 1 }
  0x2d   :  { %123 = vsyncpa [#allocation4], 1 }

</bundles_post_ra>
